<compile_context>
chip_gen: v7x
topology: tpu7x:2x2x1
jax: 0.10.0
libtpu: 0.0.40
codegen_flags: <defaults>
</compile_context>

<pallas_src>
import jax
import jax.numpy as jnp
from jax.experimental import pallas as pl
from jax.experimental.pallas import tpu as pltpu


def _round_up(x, m):
    return ((x + m - 1) // m) * m


def value_net_kernel(x_ref, w1_ref, b1_ref, w2_ref, b2_ref, out_ref):
    # fc1 on the MXU, bias + ReLU on the VPU; hidden activations never leave vregs.
    h = jnp.dot(x_ref[...], w1_ref[...], preferred_element_type=jnp.float32)
    h = jnp.maximum(h + b1_ref[...], 0.0)                       # (BT, H)
    # fc2 as VPU multiply + XLU lane-reduce (no N=1 MXU matmul, no MRF/MRB pop).
    v = jnp.sum(h * w2_ref[...], axis=-1) + b2_ref[0]           # (BT,)
    # Lane-dense writeback: fold the BT values into a (BT//128, 128) slab.
    out_ref[...] = v.reshape(out_ref.shape).astype(out_ref.dtype)


def value_network_forward(state, w1, b1, w2, b2, *, block_rows=2048):
    """state: [B, S] float32 -> value: [B, 1] float32.

    Computes relu(state @ W1 + b1) @ W2 + b2, tiled over the batch.
    block_rows must be a multiple of 1024 so the output tile is (>=8, 128).
    """
    assert block_rows % 1024 == 0
    B, S = state.shape
    H = w1.shape[1]

    # Row tile: a single full (128-padded) block for small batches, otherwise
    # block_rows-sized steps (big tiles amortize the ~0.35 us/step overhead).
    if B <= block_rows:
        bt = _round_up(B, 128)
    else:
        bt = block_rows
    b_pad = _round_up(B, bt)

    x = state
    if b_pad != B:
        # TODO(synk): callers should prefer B % block_rows == 0 to avoid this pad copy.
        x = jnp.pad(state, ((0, b_pad - B), (0, 0)))

    grid = (b_pad // bt,)
    out_rows = b_pad // 128
    blk_rows = bt // 128

    b1_2d = b1.reshape(1, H).astype(jnp.float32)
    w2_row = w2.reshape(1, H).astype(jnp.float32)   # PyTorch fc2 weight as a row
    b2_1d = b2.reshape(1).astype(jnp.float32)

    cost = pl.CostEstimate(
        flops=2 * b_pad * S * H + 3 * b_pad * H,
        transcendentals=0,
        bytes_accessed=4 * (b_pad * S + S * H + 2 * H + 1 + b_pad),
    )

    out2d = pl.pallas_call(
        value_net_kernel,
        out_shape=jax.ShapeDtypeStruct((out_rows, 128), jnp.float32),
        grid=grid,
        in_specs=[
            pl.BlockSpec((bt, S), lambda i: (i, 0)),        # streamed state tile
            pl.BlockSpec((S, H), lambda i: (0, 0)),         # resident W1
            pl.BlockSpec((1, H), lambda i: (0, 0)),         # resident b1
            pl.BlockSpec((1, H), lambda i: (0, 0)),         # resident W2 row
            pl.BlockSpec(memory_space=pltpu.MemorySpace.SMEM),  # scalar b2
        ],
        out_specs=pl.BlockSpec((blk_rows, 128), lambda i: (i, 0)),
        compiler_params=pltpu.CompilerParams(
            dimension_semantics=("parallel",),
        ),
        cost_estimate=cost,
    )(x, w1, b1_2d, w2_row, b2_1d)

    return out2d.reshape(b_pad, 1)[:B]


def init_params(key, state_size, hidden_size=64):
    """Deterministic init mirroring PyTorch nn.Linear default (U[-1/sqrt(fan_in), +])."""
    k1, k2, k3, k4 = jax.random.split(key, 4)
    bound1 = 1.0 / jnp.sqrt(state_size)
    bound2 = 1.0 / jnp.sqrt(hidden_size)
    # Stored transposed relative to PyTorch's [out, in] layout.
    w1 = jax.random.uniform(k1, (state_size, hidden_size), jnp.float32, -bound1, bound1)
    b1 = jax.random.uniform(k2, (hidden_size,), jnp.float32, -bound1, bound1)
    w2 = jax.random.uniform(k3, (hidden_size, 1), jnp.float32, -bound2, bound2)
    b2 = jax.random.uniform(k4, (1,), jnp.float32, -bound2, bound2)
    return w1, b1, w2, b2


def reference_forward(state, w1, b1, w2, b2):
    h = jnp.maximum(state @ w1 + b1, 0.0)
    return h @ w2 + b2


if __name__ == "__main__":
    key = jax.random.PRNGKey(0)
    k_param, k_s1, k_s2 = jax.random.split(key, 3)

    state_size = 8
    hidden_size = 64

    w1, b1, w2, b2 = init_params(k_param, state_size, hidden_size)

    # Small batch (single grid step, padded to one 128-row tile).
    state_small = jax.random.normal(k_s1, (8, state_size), dtype=jnp.float32)
    out_small = jax.block_until_ready(value_network_forward(state_small, w1, b1, w2, b2))
    ref_small = reference_forward(state_small, w1, b1, w2, b2)
    assert out_small.shape == (8, 1), out_small.shape
    assert jnp.allclose(out_small, ref_small, atol=1e-4, rtol=1e-4)

    # Larger batch exercising the multi-step batch grid (2 steps of 2048 rows).
    state_big = jax.random.normal(k_s2, (4096, state_size), dtype=jnp.float32)
    out_big = jax.block_until_ready(value_network_forward(state_big, w1, b1, w2, b2))
    ref_big = reference_forward(state_big, w1, b1, w2, b2)
    assert out_big.shape == (4096, 1), out_big.shape
    assert jnp.allclose(out_big, ref_big, atol=1e-4, rtol=1e-4)

    print("KERNEL_OK")
</pallas_src>

<mosaic_0001>
module attributes {stable_mosaic.version = 11 : i64} {
  func.func @value_net_kernel(%arg0: i32, %arg1: memref<128x8xf32, #tpu.memory_space<vmem>>, %arg2: memref<8x64xf32, #tpu.memory_space<vmem>>, %arg3: memref<1x64xf32, #tpu.memory_space<vmem>>, %arg4: memref<1x64xf32, #tpu.memory_space<vmem>>, %arg5: memref<1xf32, #tpu.memory_space<smem>>, %arg6: memref<1x128xf32, #tpu.memory_space<vmem>>) attributes {dimension_semantics = [#tpu.dimension_semantics<parallel>], iteration_bounds = array<i64: 1>, scalar_prefetch = 0 : i64, scratch_operands = 0 : i64, tpu.core_type = #tpu.core_type<tc>, window_params = [{transform_indices = @transform_0, window_bounds = array<i64: 128, 8>}, {pipeline_mode = #tpu.pipeline_mode<synchronous>, transform_indices = @transform_1, window_bounds = array<i64: 8, 64>}, {pipeline_mode = #tpu.pipeline_mode<synchronous>, transform_indices = @transform_2, window_bounds = array<i64: 1, 64>}, {pipeline_mode = #tpu.pipeline_mode<synchronous>, transform_indices = @transform_3, window_bounds = array<i64: 1, 64>}, {transform_indices = @transform_4, window_bounds = array<i64: 1>}, {transform_indices = @transform_5, window_bounds = array<i64: 1, 128>}]} {
    %c0 = arith.constant 0 : index
    %c0_0 = arith.constant 0 : index
    %0 = vector.load %arg1[%c0, %c0_0] : memref<128x8xf32, #tpu.memory_space<vmem>>, vector<128x8xf32>
    %c0_1 = arith.constant 0 : index
    %c0_2 = arith.constant 0 : index
    %1 = vector.load %arg2[%c0_1, %c0_2] : memref<8x64xf32, #tpu.memory_space<vmem>>, vector<8x64xf32>
    %cst = arith.constant dense<0.000000e+00> : vector<128x64xf32>
    %2 = tpu.matmul %0, %1, %cst {dimension_numbers = #tpu.dot_dimension_numbers<[1], [0], [0], [1], [0, 0, 1, 1], [], []>} : vector<128x8xf32>, vector<8x64xf32>, vector<128x64xf32> -> vector<128x64xf32>
    %c0_3 = arith.constant 0 : index
    %c0_4 = arith.constant 0 : index
    %3 = vector.load %arg3[%c0_3, %c0_4] : memref<1x64xf32, #tpu.memory_space<vmem>>, vector<1x64xf32>
    %4 = vector.broadcast %3 : vector<1x64xf32> to vector<128x64xf32>
    %5 = arith.addf %2, %4 : vector<128x64xf32>
    %cst_5 = arith.constant 0.000000e+00 : f32
    %6 = vector.broadcast %cst_5 : f32 to vector<128x64xf32>
    %7 = arith.maximumf %5, %6 : vector<128x64xf32>
    %c0_6 = arith.constant 0 : index
    %c0_7 = arith.constant 0 : index
    %8 = vector.load %arg4[%c0_6, %c0_7] : memref<1x64xf32, #tpu.memory_space<vmem>>, vector<1x64xf32>
    %9 = vector.broadcast %8 : vector<1x64xf32> to vector<128x64xf32>
    %10 = arith.mulf %7, %9 : vector<128x64xf32>
    %cst_8 = arith.constant dense<0.000000e+00> : vector<128xf32>
    %11 = vector.multi_reduction <add>, %10, %cst_8 [1] : vector<128x64xf32> to vector<128xf32>
    %c0_9 = arith.constant 0 : index
    %12 = memref.load %arg5[%c0_9] : memref<1xf32, #tpu.memory_space<smem>>
    %13 = vector.broadcast %12 : f32 to vector<128xf32>
    %14 = arith.addf %11, %13 : vector<128xf32>
    %15 = vector.shape_cast %14 : vector<128xf32> to vector<1x128xf32>
    %c0_10 = arith.constant 0 : index
    %c0_11 = arith.constant 0 : index
    %16 = vector.load %arg6[%c0_10, %c0_11] : memref<1x128xf32, #tpu.memory_space<vmem>>, vector<1x128xf32>
    tpu.vector_store %arg6[%c0_10, %c0_11], %15 {strides = array<i32>} : memref<1x128xf32, #tpu.memory_space<vmem>>, vector<1x128xf32>,
    return
  }
  func.func @transform_0(%arg0: i32) -> (i32, i32) {
    %c0_i32 = arith.constant 0 : i32
    %c0_i32_0 = arith.constant 0 : i32
    return %arg0, %c0_i32 : i32, i32
  }
  func.func @transform_1(%arg0: i32) -> (i32, i32) {
    %c0_i32 = arith.constant 0 : i32
    %c0_i32_0 = arith.constant 0 : i32
    %c0_i32_1 = arith.constant 0 : i32
    return %c0_i32, %c0_i32_0 : i32, i32
  }
  func.func @transform_2(%arg0: i32) -> (i32, i32) {
    %c0_i32 = arith.constant 0 : i32
    %c0_i32_0 = arith.constant 0 : i32
    %c0_i32_1 = arith.constant 0 : i32
    return %c0_i32, %c0_i32_0 : i32, i32
  }
  func.func @transform_3(%arg0: i32) -> (i32, i32) {
    %c0_i32 = arith.constant 0 : i32
    %c0_i32_0 = arith.constant 0 : i32
    %c0_i32_1 = arith.constant 0 : i32
    return %c0_i32, %c0_i32_0 : i32, i32
  }
  func.func @transform_4(%arg0: i32) -> i32 {
    %c0_i32 = arith.constant 0 : i32
    %c0_i32_0 = arith.constant 0 : i32
    return %c0_i32 : i32
  }
  func.func @transform_5(%arg0: i32) -> (i32, i32) {
    %c0_i32 = arith.constant 0 : i32
    %c0_i32_0 = arith.constant 0 : i32
    return %arg0, %c0_i32 : i32, i32
  }
}

</mosaic_0001>

<bundles_post_ra>
// kernel: tpu_custom_call.1
= control target key start
LH: loop header
LB: loop body
LE: loop exit
PB: predicated region body
PF: predicated region fallthrough
CT: control target
= control target key end

     0   :  { %vm46_vm0 = vcmask 64512   ;;  %s827_s0 = inlined_call_operand.vmem [shape: f32[128,8], index: 0, kind: input, shape index: {}]   ;;  %s828_s1 = inlined_call_operand.vmem [shape: f32[8,64], index: 1, kind: input, shape index: {}]   ;;  %s829_s2 = inlined_call_operand.vmem [shape: f32[1,64], index: 2, kind: input, shape index: {}]   ;;  %s830_s3 = inlined_call_operand.vmem [shape: f32[1,64], index: 3, kind: input, shape index: {}]   ;;  %s831_s4 = inlined_call_operand.<no memory space> [shape: f32[1], index: 4, kind: input, shape index: {}]   ;;  %s832_s5 = inlined_call_operand.hbm [shape: f32[1,128], index: 5, kind: output, shape index: {}]  }
   0x1   :  { %v38_v0 = vld [vmem:[%s828_s1] sm:$0xff]  ;;  %v23_v3 = vld [vmem:[%s827_s0 + $0x8] sm:$0xff]  ;;  %v24_v5 = vld [vmem:[%s827_s0 + $0x10] sm:$0xff] }
   0x2   :  { %v22_v1 = vld [vmem:[%s827_s0] sm:$0xff]  ;;  %524 = vmatprep.subr.mxu0 %v38_v0  ;;  %550 = vmatprep.subr.mxu1 %v38_v0  ;;  %v31_v4 = vld [vmem:[%s827_s0 + $0x48] sm:$0xff]  ;;  %v32_v6 = vld [vmem:[%s827_s0 + $0x50] sm:$0xff] }
   0x3   :  { %v30_v2 = vld [vmem:[%s827_s0 + $0x40] sm:$0xff]  ;;  %525 = vmatpush3.msra.mxu0 %v38_v0  ;;  %551 = vmatpush3.msra.mxu1 %v38_v0  ;;  %v25_v7 = vld [vmem:[%s827_s0 + $0x18] sm:$0xff] }
   0x4   :  { %526 = vmatprep.mubr.msk.f32.mxu0 %vm46_vm0, %v22_v1  ;;  %538 = vmatprep.mubr.msk.f32.mxu1 %vm46_vm0, %v30_v2  ;;  %v33_v8 = vld [vmem:[%s827_s0 + $0x58] sm:$0xff] }
   0x5   :  { %527 = vmatmul.mubr.msk.f32.vlgmr.msra.gmra.mrb[0].mxu0 %vm46_vm0, %v23_v3  ;;  %539 = vmatmul.mubr.msk.f32.vlgmr.msra.gmra.mrb[0].mxu1 %vm46_vm0, %v31_v4 }
   0x6   :  { %529 = vmatprep.mubr.msk.f32.mxu0 %vm46_vm0, %v24_v5  ;;  %541 = vmatprep.mubr.msk.f32.mxu1 %vm46_vm0, %v32_v6 }
   0x7   :  { %11 = vsyncpa [#allocation4], 0  ;;  %v26_v9 = vld [vmem:[%s827_s0 + $0x20] sm:$0xff]  ;;  %v27_v11 = vld [vmem:[%s827_s0 + $0x28] sm:$0xff]  ;;  %vm279_vm1 = vcmask 523264   ;;  %vm373_vm2 = vcmask 130112  }
   0x8   :  { %v34_v10 = vld [vmem:[%s827_s0 + $0x60] sm:$0xff]  ;;  %v35_v12 = vld [vmem:[%s827_s0 + $0x68] sm:$0xff]  ;;  %v28_v13 = vld [vmem:[%s827_s0 + $0x30] sm:$0xff]  ;;  %vm380_vm3 = vcmask 195712   ;;  %vm387_vm4 = vcmask 261312   ;;  %vm394_vm5 = vcmask 326912  }
   0x9   :  { %530 = vmatmul.mubr.msk.f32.gmra.mrb[2].mxu0 %vm46_vm0, %v25_v7  ;;  %542 = vmatmul.mubr.msk.f32.gmra.mrb[2].mxu1 %vm46_vm0, %v33_v8  ;;  %v36_v14 = vld [vmem:[%s827_s0 + $0x70] sm:$0xff]  ;;  %v29_v15 = vld [vmem:[%s827_s0 + $0x38] sm:$0xff]  ;;  %v678_v17 = vld [vmem:[%s829_s2] ss:$0 sm:$0xff]  ;;  %vm401_vm6 = vcmask 392512   ;;  %vm408_vm7 = vcmask 458112  }
   0xa   :  { %532 = vmatprep.mubr.msk.f32.mxu0 %vm46_vm0, %v26_v9  ;;  %544 = vmatprep.mubr.msk.f32.mxu1 %vm46_vm0, %v34_v10  ;;  %v37_v16 = vld [vmem:[%s827_s0 + $0x78] sm:$0xff]  ;;  %v687_v26 = vld [vmem:[%s830_s3] ss:$0 sm:$0xff]  ;;  %vm415_vm8 = vcmask 523712   ;;  %vm422_vm9 = vcmask 589312   ;;  %vm429_vm10 = vcmask 654912  }
   0xb   :  { %vm436_vm11 = vcmask 720512   ;;  %vm443_vm12 = vcmask 786112   ;;  %vm450_vm13 = vcmask 851712   ;;  %vm457_vm14 = vcmask 917312  }
   0xc   :  { %vm464_vm15 = vcmask 982912  }
   0xd   :  { %533 = vmatmul.mubr.msk.f32.gmra.mrb[4].mxu0 %vm46_vm0, %v27_v11  ;;  %545 = vmatmul.mubr.msk.f32.gmra.mrb[4].mxu1 %vm46_vm0, %v35_v12 }
   0xe   :  { %535 = vmatprep.mubr.msk.f32.mxu0 %vm46_vm0, %v28_v13  ;;  %547 = vmatprep.mubr.msk.f32.mxu1 %vm46_vm0, %v36_v14 }
  0x11   :  { %536 = vmatmul.mubr.msk.f32.gmra.mrb[6].mxu0 %vm46_vm0, %v29_v15  ;;  %548 = vmatmul.mubr.msk.f32.gmra.mrb[6].mxu1 %vm46_vm0, %v37_v16  ;;  %vm471_vm0 = vcmask 1048512  }
  0xd8   :  { %v528_v18 = vpop.f32.mrb[0].mxu0  ;;  %v540_v19 = vpop.f32.mrb[0].mxu1 }
  0xd9   :  { %v167_v20 = vadd.f32 %v528_v18, %v678_v17  ;;  %v207_v21 = vadd.f32 %v540_v19, %v678_v17  ;;  %v161_v22 = vpop.f32.mrb[1].mxu0  ;;  %v201_v23 = vpop.f32.mrb[1].mxu1 }
  0xda   :  { %v162_v24 = vadd.f32 %v678_v17, %v161_v22  ;;  %v202_v25 = vadd.f32 %v678_v17, %v201_v23 }
  0xdb   :  { %v241_v27 = vmax.f32 %v167_v20, 0.0  ;;  %v249_v28 = vmax.f32 %v207_v21, 0.0 }
  0xdc   :  { %v240_v29 = vmax.f32 %v162_v24, 0.0  ;;  %v531_v30 = vpop.f32.mrb[2].mxu0  ;;  %v543_v31 = vpop.f32.mrb[2].mxu1  ;;  %v248_v38 = vmax.f32 %v202_v25, 0.0 }
  0xdd   :  { %v177_v32 = vadd.f32 %v531_v30, %v678_v17  ;;  %v171_v33 = vpop.f32.mrb[3].mxu0  ;;  %v272_v34 = vmul.f32 %v687_v26, %v249_v28  ;;  %v217_v35 = vadd.f32 %v543_v31, %v678_v17  ;;  %v264_v36 = vmul.f32 %v687_v26, %v241_v27  ;;  %v211_v37 = vpop.f32.mrb[3].mxu1 }
  0xde   :  { %v172_v39 = vadd.f32 %v678_v17, %v171_v33  ;;  %v212_v40 = vadd.f32 %v678_v17, %v211_v37  ;;  %v263_v41 = vmul.f32 %v687_v26, %v240_v29  ;;  %v271_v54 = vmul.f32 %v687_v26, %v248_v38 }
  0xdf   :  { %v243_v42 = vmax.f32 %v177_v32, 0.0  ;;  %v307_v43 = vsel %vm279_vm1, %v272_v34, 0.0  ;;  %v251_v44 = vmax.f32 %v217_v35, 0.0  ;;  %v283_v45 = vsel %vm279_vm1, %v264_v36, 0.0 }
  0xe0   :  { %308 = vadd.xlane.f32.xlu1 %v307_v43  ;;  %284 = vadd.xlane.f32.xlu0 %v283_v45  ;;  %v534_v46 = vpop.f32.mrb[4].mxu0  ;;  %v546_v47 = vpop.f32.mrb[4].mxu1  ;;  %v242_v55 = vmax.f32 %v172_v39, 0.0  ;;  %v250_v56 = vmax.f32 %v212_v40, 0.0  ;;  %v280_v58 = vsel %vm279_vm1, %v263_v41, 0.0  ;;  %v304_v4 = vsel %vm279_vm1, %v271_v54, 0.0 }
  0xe1   :  { %v266_v48 = vmul.f32 %v687_v26, %v243_v42  ;;  %v187_v49 = vadd.f32 %v534_v46, %v678_v17  ;;  %v181_v50 = vpop.f32.mrb[5].mxu0  ;;  %v274_v51 = vmul.f32 %v687_v26, %v251_v44  ;;  %v221_v52 = vpop.f32.mrb[5].mxu1  ;;  %v227_v7 = vadd.f32 %v546_v47, %v678_v17 }
  0xe2   :  { %v182_v53 = vadd.f32 %v678_v17, %v181_v50  ;;  %v265_v5 = vmul.f32 %v687_v26, %v242_v55  ;;  %v273_v6 = vmul.f32 %v687_v26, %v250_v56  ;;  %v222_v8 = vadd.f32 %v678_v17, %v221_v52 }
  0xe3   :  { %v289_v57 = vsel %vm279_vm1, %v266_v48, 0.0  ;;  %v245_v61 = vmax.f32 %v187_v49, 0.0  ;;  %v313_v63 = vsel %vm279_vm1, %v274_v51, 0.0  ;;  %v253_v15 = vmax.f32 %v227_v7, 0.0 }
  0xe4   :  { %290 = vadd.xlane.f32.xlu1 %v289_v57  ;;  %281 = vadd.xlane.f32.xlu0 %v280_v58  ;;  %v537_v59 = vpop.f32.mrb[6].mxu0  ;;  %v549_v60 = vpop.f32.mrb[6].mxu1  ;;  %v244_v62 = vmax.f32 %v182_v53, 0.0  ;;  %v286_v13 = vsel %vm279_vm1, %v265_v5, 0.0  ;;  %v310_v14 = vsel %vm279_vm1, %v273_v6, 0.0  ;;  %v252_v16 = vmax.f32 %v222_v8, 0.0 }
  0xe5   :  { %v197_v0 = vadd.f32 %v537_v59, %v678_v17  ;;  %v191_v1 = vpop.f32.mrb[7].mxu0  ;;  %v231_v2 = vpop.f32.mrb[7].mxu1  ;;  %v268_v11 = vmul.f32 %v687_v26, %v245_v61  ;;  %v237_v18 = vadd.f32 %v549_v60, %v678_v17  ;;  %v276_v24 = vmul.f32 %v687_v26, %v253_v15 }
  0xe6   :  { %v192_v3 = vadd.f32 %v678_v17, %v191_v1  ;;  %v267_v12 = vmul.f32 %v687_v26, %v244_v62  ;;  %v232_v19 = vadd.f32 %v678_v17, %v231_v2  ;;  %v275_v25 = vmul.f32 %v687_v26, %v252_v16 }
  0xe7   :  { %v247_v9 = vmax.f32 %v197_v0, 0.0  ;;  %v295_v20 = vsel %vm279_vm1, %v268_v11, 0.0  ;;  %v255_v27 = vmax.f32 %v237_v18, 0.0  ;;  %v319_v30 = vsel %vm279_vm1, %v276_v24, 0.0 }
  0xe8   :  { %314 = vadd.xlane.f32.xlu1 %v313_v63  ;;  %305 = vadd.xlane.f32.xlu0 %v304_v4  ;;  %v246_v10 = vmax.f32 %v192_v3, 0.0  ;;  %v292_v21 = vsel %vm279_vm1, %v267_v12, 0.0  ;;  %v254_v28 = vmax.f32 %v232_v19, 0.0  ;;  %v316_v31 = vsel %vm279_vm1, %v275_v25, 0.0 }
  0xe9   :  { %v270_v22 = vmul.f32 %v687_v26, %v247_v9  ;;  %v278_v32 = vmul.f32 %v687_v26, %v255_v27  ;;  %v362_v36 = vlaneseq  ;;  %v743_v43 = vstv %s831_s4  ;;  %s577_s4 = smov [#allocation3]  }
  0xea   :  { %v269_v23 = vmul.f32 %v687_v26, %v246_v10  ;;  %v277_v33 = vmul.f32 %v687_v26, %v254_v28  ;;  %s481_s28 = sshll.u32 %s577_s4, 4  ;;  %s482_s28 = int_to_ptr.vmem [resolvable:$true] %s481_s28 }
  0xeb   :  { %v301_v29 = vsel %vm279_vm1, %v270_v22, 0.0  ;;  %v325_v34 = vsel %vm279_vm1, %v278_v32, 0.0  ;;  %v735_v39 = vand.u32 127, %v362_v36  ;;  %v737_v42 = vshrl.u32 %v362_v36, 7  ;;  %s553_s29 = scalar_lea.vmem %s482_s28, 16  ;;  %s557_s30 = scalar_lea.vmem %s482_s28, 32 }
  0xec   :  { %287 = vadd.xlane.f32.xlu1 %v286_v13  ;;  %311 = vadd.xlane.f32.xlu0 %v310_v14  ;;  %v298_v17 = vsel %vm279_vm1, %v269_v23, 0.0  ;;  %v322_v35 = vsel %vm279_vm1, %v277_v33, 0.0  ;;  %p554_p0 = scmp.ne.s32.totalorder %s482_s28, %s553_s29  ;;  %p558_p1 = scmp.lt.s32.totalorder %s482_s28, %s482_s28 }
  0xed   :  { %v368_v26 = vadd.s32 4294967288, %v735_v39  ;;  %v375_v44 = vadd.s32 4294967280, %v735_v39  ;;  %v366_v45 = vsub.s32 %v735_v39, %v737_v42  ;;  %v752_v49 = vadd.s32 4294967224, %v735_v39  ;;  %p559_p2 = scmp.lt.s32.totalorder %s557_s30, %s553_s29 }
  0xee   :  { %v382_v50 = vadd.s32 4294967272, %v735_v39  ;;  %v758_v53 = vadd.s32 4294967232, %v735_v39  ;;  %v389_v55 = vadd.s32 4294967264, %v735_v39  ;;  %v763_v57 = vadd.s32 4294967208, %v735_v39 }
  0xef   :  { %v371_v51 = vsub.s32 %v368_v26, %v737_v42  ;;  %v378_v54 = vsub.s32 %v375_v44, %v737_v42  ;;  %v766_v59 = vadd.s32 4294967216, %v735_v39  ;;  %v396_v61 = vadd.s32 4294967256, %v735_v39  ;;  %p560_p3 = por %p559_p2, %p558_p1 }
  0xf0   :  { %296 = vadd.xlane.f32.xlu1 %v295_v20  ;;  %293 = vadd.xlane.f32.xlu0 %v292_v21  ;;  %v427_v62 = vsub.s32 %v752_v49, %v737_v42  ;;  %v385_v63 = vsub.s32 %v382_v50, %v737_v42  ;;  %v410_v3 = vadd.s32 4294967240, %v735_v39  ;;  %v420_v4 = vsub.s32 %v758_v53, %v737_v42 }
  0xf1   :  { %v392_v6 = vsub.s32 %v389_v55, %v737_v42  ;;  %v403_v7 = vadd.s32 4294967248, %v735_v39  ;;  %v441_v9 = vsub.s32 %v763_v57, %v737_v42  ;;  %v434_v10 = vsub.s32 %v766_v59, %v737_v42  ;;  %p561_p4 = pnand %p560_p3, %p554_p0 }
  0xf2   :  { %v399_v11 = vsub.s32 %v396_v61, %v737_v42  ;;  %v413_v19 = vsub.s32 %v410_v3, %v737_v42  ;;  %v452_v20 = vadd.s32 4294967192, %v735_v39  ;;  %v445_v28 = vadd.s32 4294967200, %v735_v39 }
  0xf3   :  { %v406_v22 = vsub.s32 %v403_v7, %v737_v42 }
  0xf4   :  { %302 = vadd.xlane.f32.xlu1 %v301_v29  ;;  %299 = vadd.xlane.f32.xlu0 %v298_v17  ;;  %v455_v33 = vsub.s32 %v452_v20, %v737_v42 }
  0xf8   :  { %320 = vadd.xlane.f32.xlu1 %v319_v30  ;;  %317 = vadd.xlane.f32.xlu0 %v316_v31 }
  0xfc   :  { %326 = vadd.xlane.f32.xlu1 %v325_v34  ;;  %323 = vadd.xlane.f32.xlu0 %v322_v35  ;;  %v466_v34 = vadd.s32 4294967176, %v735_v39 }
  0xfe   :  { %v469_v53 = vsub.s32 %v466_v34, %v737_v42 }
 0x16d   :  { %v733_v37 = vpop.xlane.xlu1 %308  ;;  %v285_v38 = vpop.xlane.xlu0 %284 }
 0x16e   :  { %v331_v52 = vadd.f32 %v743_v43, %v285_v38  ;;  %v339_v32 = vadd.f32 %v743_v43, %v733_v37  ;;  %v448_v37 = vsub.s32 %v445_v28, %v737_v42 }
 0x170   :  { %v372_v1 = vrot.slane %v331_v52, %v371_v51  ;;  %v428_v50 = vrot.slane %v339_v32, %v427_v62 }
 0x171   :  { %v291_v40 = vpop.xlane.xlu1 %290  ;;  %v282_v41 = vpop.xlane.xlu0 %281 }
 0x172   :  { %v330_v46 = vadd.f32 %v743_v43, %v282_v41  ;;  %v333_v2 = vadd.f32 %v743_v43, %v291_v40  ;;  %v459_v40 = vadd.s32 4294967184, %v735_v39 }
 0x174   :  { %v367_v56 = vrot.slane %v330_v46, %v366_v45  ;;  %v386_v18 = vrot.slane %v333_v2, %v385_v63 }
 0x175   :  { %v749_v47 = vpop.xlane.xlu1 %314  ;;  %v306_v48 = vpop.xlane.xlu0 %305 }
 0x176   :  { %v374_v8 = vsel %vm373_vm2, %v372_v1, %v367_v56  ;;  %v338_v29 = vadd.f32 %v743_v43, %v306_v48  ;;  %v341_v41 = vadd.f32 %v743_v43, %v749_v47 }
 0x178   :  { %v421_v46 = vrot.slane %v338_v29, %v420_v4  ;;  %v442_v55 = vrot.slane %v341_v41, %v441_v9 }
 0x179   :  { %v288_v58 = vpop.xlane.xlu1 %287  ;;  %v312_v60 = vpop.xlane.xlu0 %311 }
 0x17a   :  { %v332_v0 = vadd.f32 %v743_v43, %v288_v58  ;;  %v340_v35 = vadd.f32 %v743_v43, %v312_v60 }
 0x17c   :  { %v379_v5 = vrot.slane %v332_v0, %v378_v54  ;;  %v435_v47 = vrot.slane %v340_v35, %v434_v10  ;;  %v462_v54 = vsub.s32 %v459_v40, %v737_v42 }
 0x17d   :  { %v297_v12 = vpop.xlane.xlu1 %296  ;;  %v294_v13 = vpop.xlane.xlu0 %293 }
 0x17e   :  { %v381_v14 = vsel %vm380_vm3, %v379_v5, %v374_v8  ;;  %v335_v15 = vadd.f32 %v743_v43, %v297_v12  ;;  %v334_v16 = vadd.f32 %v743_v43, %v294_v13 }
 0x17f   :  { %v388_v24 = vsel %vm387_vm4, %v386_v18, %v381_v14 }
 0x180   :  { %v393_v21 = vrot.slane %v334_v16, %v392_v6  ;;  %v400_v23 = vrot.slane %v335_v15, %v399_v11 }
 0x181   :  { %v303_v25 = vpop.xlane.xlu1 %302  ;;  %v300_v27 = vpop.xlane.xlu0 %299 }
 0x182   :  { %v395_v17 = vsel %vm394_vm5, %v393_v21, %v388_v24  ;;  %v337_v30 = vadd.f32 %v743_v43, %v303_v25  ;;  %v336_v31 = vadd.f32 %v743_v43, %v300_v27 }
 0x183   :  { %v402_v26 = vsel %vm401_vm6, %v400_v23, %v395_v17 }
 0x184   :  { %v414_v36 = vrot.slane %v337_v30, %v413_v19  ;;  %v407_v38 = vrot.slane %v336_v31, %v406_v22 }
 0x185   :  { %v321_v44 = vpop.xlane.xlu1 %320  ;;  %v318_v45 = vpop.xlane.xlu0 %317 }
 0x186   :  { %v409_v48 = vsel %vm408_vm7, %v407_v38, %v402_v26  ;;  %v342_v49 = vadd.f32 %v743_v43, %v318_v45  ;;  %v343_v39 = vadd.f32 %v743_v43, %v321_v44 }
 0x187   :  { %v416_v51 = vsel %vm415_vm8, %v414_v36, %v409_v48 }
 0x188   :  { %v423_v52 = vsel %vm422_vm9, %v421_v46, %v416_v51  ;;  %v449_v60 = vrot.slane %v342_v49, %v448_v37  ;;  %v456_v63 = vrot.slane %v343_v39, %v455_v33 }
 0x189   :  { %v430_v56 = vsel %vm429_vm10, %v428_v50, %v423_v52  ;;  %v327_v57 = vpop.xlane.xlu1 %326  ;;  %v324_v58 = vpop.xlane.xlu0 %323 }
 0x18a   :  { %v437_v59 = vsel %vm436_vm11, %v435_v47, %v430_v56  ;;  %v345_v61 = vadd.f32 %v743_v43, %v327_v57  ;;  %v344_v62 = vadd.f32 %v743_v43, %v324_v58 }
 0x18b   :  { %v444_v0 = vsel %vm443_vm12, %v442_v55, %v437_v59 }
 0x18c   :  { %v451_v42 = vsel %vm450_vm13, %v449_v60, %v444_v0  ;;  %v470_v1 = vrot.slane %v345_v61, %v469_v53  ;;  %v463_v2 = vrot.slane %v344_v62, %v462_v54 }
 0x18d   :  { %v458_v3 = vsel %vm457_vm14, %v456_v63, %v451_v42 }
 0x18e   :  { %v465_v4 = vsel %vm464_vm15, %v463_v2, %v458_v3 }
 0x18f   :  { %v472_v5 = vsel %vm471_vm0, %v470_v1, %v465_v4 }
 0x190   :  { %474 = vst [vmem:[#allocation3] sm:$0x1] %v472_v5 }
 0x191   :  { %564 = shalt.err (!%p561_p4)
}
 0x192   :  { %s565_s8 = scalar_lea.hbm %s832_s5, 16 }
 0x193   :  { %p566_p5 = scmp.ne.s32.totalorder %s832_s5, %s565_s8  ;;  %p569_p6 = scmp.lt.u32.totalorder %s565_s8, %s832_s5 }
 0x195   :  { %p571_p7 = pnand %p569_p6, %p566_p5 }
 0x197   :  { %574 = shalt.err (!%p571_p7)
}
 0x198   :  { %484 = dma.vmem_to_hbm [thread:$0]  %s482_s28, 16, %s832_s5, [#allocation4]  }
 0x199   :  { %575 = dma.done.wait [#allocation4], 16  }
 0x19a   :  { %576 = vsyncadd [#allocation4], 4294967280 }
 0x19b   :  { %488 = vsyncpa [#allocation4], 1 }

</bundles_post_ra>
